<compile_context>
chip_gen: v7x
topology: tpu7x:2x2x1
jax: 0.10.0
libtpu: 0.0.40
codegen_flags: <defaults>
</compile_context>

<pallas_src>
import jax
import jax.numpy as jnp
import numpy as np
from jax.experimental import pallas as pl
from jax.experimental.pallas import tpu as pltpu


def _round_up(x, m):
    return ((x + m - 1) // m) * m


def _tensorcores_per_chip():
    """2 on v7x (dual TensorCore shares the 'parallel' grid axis), else 1."""
    try:
        kind = jax.devices()[0].device_kind.lower()
    except Exception:
        return 1
    return 2 if "v7" in kind else 1


def _nca_kernel(x_ref, w1_ref, w2_ref, b2_ref, w3_ref, b3_ref, o_ref):
    # x_ref : (K_pad, TM)        im2col activations (+ ones row for b1), pixels on lanes
    # w1_ref: (n_hid, K_pad)     transposed 3x3-conv weight, b1 folded into spare column
    # w2_ref: (n_hid, n_hid)     transposed 1x1-conv weight
    # w3_ref: (C_out_pad, n_hid) transposed 1x1-conv weight
    # b*_ref: (n, 1)             column biases (broadcast along lanes)
    # o_ref : (C_out_pad, TM)    lane-dense output block
    h1 = jnp.maximum(
        jnp.dot(w1_ref[...], x_ref[...], preferred_element_type=jnp.float32),
        0.0)
    h2 = jnp.maximum(
        jnp.dot(w2_ref[...], h1, preferred_element_type=jnp.float32)
        + b2_ref[...], 0.0)
    h3 = jnp.maximum(
        jnp.dot(w3_ref[...], h2, preferred_element_type=jnp.float32)
        + b3_ref[...], 0.0)
    o_ref[...] = h3.astype(o_ref.dtype)


@jax.jit
def nca_forward(obs, w1, b1, w2, b2, w3, b3):
    """obs: (B, S1, S2, C_in) float32 -> flat features (B, S1*S2*C_out)."""
    B, S1, S2, C_in = obs.shape
    C_in2 = C_in + 2
    n_hid = w1.shape[-1]
    C_out = w3.shape[-1]
    P = S1 * S2
    M_total = B * P
    K = 9 * C_in2
    K_pad = _round_up(K + 1, 8)          # +1 row for the folded-in b1
    C_out_pad = _round_up(C_out, 8)

    # --- coordinate channels: th.Tensor(np.indices((S1,S2))) / max * 2 - 1 ---
    rows = jnp.broadcast_to(jnp.arange(S1, dtype=jnp.float32)[:, None], (S1, S2))
    cols = jnp.broadcast_to(jnp.arange(S2, dtype=jnp.float32)[None, :], (S1, S2))
    idx = jnp.stack([rows, cols], axis=0) / float(max(S1, S2)) * 2.0 - 1.0  # (2,S1,S2)

    # --- channel-major augmented input (C_in2, B, S1, S2): only this small,
    #     un-expanded tensor is relaid out.  The 9x im2col buffer below is
    #     built directly in (K, M) layout -- no full-size transpose.
    x_cm = jnp.concatenate(
        [jnp.moveaxis(obs, 3, 0),
         jnp.broadcast_to(idx[:, None], (2, B, S1, S2))], axis=0)
    x_hal = jnp.pad(x_cm, ((0, 0), (0, 0), (1, 1), (1, 1)))   # halo for 3x3 SAME

    # --- im2col in (K, M) layout; K ordering (dy, dx, c) matches
    #     w1.reshape(9*C_in2, n_hid) below.
    patches = jnp.stack(
        [x_hal[:, :, dy:dy + S1, dx:dx + S2]
         for dy in range(3) for dx in range(3)], axis=0)       # (9,C_in2,B,S1,S2)
    x_colT = patches.reshape(K, M_total)
    ones_row = jnp.ones((1, M_total), jnp.float32)             # activates folded b1
    x_colT = jnp.concatenate([x_colT, ones_row], axis=0)       # (K+1, M)

    # --- tile the merged (batch*pixel) axis: even split, lane-dense blocks.
    TM_MAX = 8192
    n_tc = _tensorcores_per_chip()
    num_steps = pl.cdiv(M_total, TM_MAX)
    if n_tc > 1 and M_total > 256:
        # v7x: grid length a multiple of the 2 TensorCores so the "parallel"
        # axis splits evenly.  On single-TC v5e/v6e extra steps are overhead.
        num_steps = _round_up(max(num_steps, n_tc), n_tc)
    TM = _round_up(pl.cdiv(M_total, num_steps), 128)
    M_pad = _round_up(M_total, TM)
    grid = (M_pad // TM,)

    x_colT = jnp.pad(x_colT, ((0, K_pad - (K + 1)), (0, M_pad - M_total)))

    # --- transposed weights / column biases; b1 folded into w1T's extra column
    w1_aug = jnp.concatenate([w1.reshape(K, n_hid), b1.reshape(1, n_hid)], axis=0)
    w1T = jnp.pad(w1_aug, ((0, K_pad - (K + 1)), (0, 0))).T        # (n_hid, K_pad)
    w2T = w2.T                                                     # (n_hid, n_hid)
    w3T = jnp.pad(w3.T, ((0, C_out_pad - C_out), (0, 0)))          # (C_out_pad, n_hid)
    b2c = b2.reshape(n_hid, 1)
    b3c = jnp.pad(b3, (0, C_out_pad - C_out)).reshape(C_out_pad, 1)

    # --- only raise the scoped-VMEM limit when the per-step working set needs
    #     it; cap well under v7x's 64 MiB physical VMEM.
    step_bytes = 4 * (2 * K_pad * TM + 2 * C_out_pad * TM + 3 * n_hid * TM
                      + n_hid * (K_pad + n_hid + 2) + C_out_pad * (n_hid + 1))
    vmem_limit = None
    if step_bytes > 12 * 1024 * 1024:
        vmem_limit = min(48 * 1024 * 1024, 2 * step_bytes)

    outT = pl.pallas_call(
        _nca_kernel,
        out_shape=jax.ShapeDtypeStruct((C_out_pad, M_pad), jnp.float32),
        grid_spec=pltpu.PrefetchScalarGridSpec(
            num_scalar_prefetch=0,
            grid=grid,
            in_specs=[
                pl.BlockSpec((K_pad, TM), lambda i: (0, i)),
                pl.BlockSpec((n_hid, K_pad), lambda i: (0, 0)),
                pl.BlockSpec((n_hid, n_hid), lambda i: (0, 0)),
                pl.BlockSpec((n_hid, 1), lambda i: (0, 0)),
                pl.BlockSpec((C_out_pad, n_hid), lambda i: (0, 0)),
                pl.BlockSpec((C_out_pad, 1), lambda i: (0, 0)),
            ],
            out_specs=pl.BlockSpec((C_out_pad, TM), lambda i: (0, i)),
        ),
        compiler_params=pltpu.CompilerParams(
            dimension_semantics=("parallel",),
            vmem_limit_bytes=vmem_limit),
    )(x_colT, w1T, w2T, b2c, w3T, b3c)

    # torch: x.permute(0,2,3,1).reshape(B,-1)  ==  pixel-major, channel-minor.
    # TODO(synk): if this final transpose ever shows on the profile, store
    #             (TM, C_out) blocks via an in-kernel XLU transpose instead.
    out = outT[:C_out, :M_total].T.reshape(B, P * C_out)
    return out


def _reference(obs, w1, b1, w2, b2, w3, b3):
    """Pure-JAX reference (lax conv, NHWC/HWIO), pinned to f32-accurate MXU."""
    HI = jax.lax.Precision.HIGHEST
    B, S1, S2, C_in = obs.shape
    rows = jnp.broadcast_to(jnp.arange(S1, dtype=jnp.float32)[:, None], (S1, S2))
    cols = jnp.broadcast_to(jnp.arange(S2, dtype=jnp.float32)[None, :], (S1, S2))
    idx = jnp.stack([rows, cols], axis=-1) / float(max(S1, S2)) * 2.0 - 1.0
    x = jnp.concatenate([obs, jnp.broadcast_to(idx[None], (B, S1, S2, 2))], -1)
    dn = jax.lax.conv_dimension_numbers(x.shape, w1.shape,
                                        ("NHWC", "HWIO", "NHWC"))
    x = jax.lax.conv_general_dilated(x, w1, (1, 1), "SAME",
                                     dimension_numbers=dn, precision=HI) + b1
    x = jnp.maximum(x, 0.0)
    x = jnp.einsum("bhwc,cd->bhwd", x, w2, precision=HI) + b2
    x = jnp.maximum(x, 0.0)
    x = jnp.einsum("bhwc,cd->bhwd", x, w3, precision=HI) + b3
    x = jnp.maximum(x, 0.0)
    return x.reshape(B, -1)


if __name__ == "__main__":
    # Small shapes consistent with the module:
    # obs_space.shape = (w_out, h_out, n_in_chans) = (16, 16, 4), conv_filters=32
    B, S1, S2, C_IN = 2, 16, 16, 4
    N_HID = 32
    C_OUT = C_IN

    key = jax.random.PRNGKey(0)
    k_obs, k1, k2, k3 = jax.random.split(key, 4)

    obs = jax.random.uniform(k_obs, (B, S1, S2, C_IN), dtype=jnp.float32)

    # Deterministic synthetic parameter init (HWIO conv weights).
    w1 = jax.random.normal(k1, (3, 3, C_IN + 2, N_HID), jnp.float32) * 0.1
    b1 = jnp.full((N_HID,), 0.01, jnp.float32)
    w2 = jax.random.normal(k2, (N_HID, N_HID), jnp.float32) * 0.1
    b2 = jnp.full((N_HID,), 0.01, jnp.float32)
    w3 = jax.random.normal(k3, (N_HID, C_OUT), jnp.float32) * 0.1
    b3 = jnp.full((C_OUT,), 0.01, jnp.float32)

    out = nca_forward(obs, w1, b1, w2, b2, w3, b3)
    out = jax.block_until_ready(out)

    ref = jax.block_until_ready(_reference(obs, w1, b1, w2, b2, w3, b3))
    assert out.shape == (B, S1 * S2 * C_OUT), out.shape
    # Tolerance allows for per-generation MXU default-precision differences
    # between the Pallas matmul path and the XLA conv reference.
    np.testing.assert_allclose(np.asarray(out), np.asarray(ref),
                               rtol=1e-3, atol=1e-3)

    print("KERNEL_OK")
</pallas_src>

<mosaic_0001>
module attributes {stable_mosaic.version = 11 : i64} {
  func.func @_nca_kernel(%arg0: i32, %arg1: memref<56x512xf32, #tpu.memory_space<vmem>>, %arg2: memref<32x56xf32, #tpu.memory_space<vmem>>, %arg3: memref<32x32xf32, #tpu.memory_space<vmem>>, %arg4: memref<32x1xf32, #tpu.memory_space<vmem>>, %arg5: memref<8x32xf32, #tpu.memory_space<vmem>>, %arg6: memref<8x1xf32, #tpu.memory_space<vmem>>, %arg7: memref<8x512xf32, #tpu.memory_space<vmem>>) attributes {dimension_semantics = [#tpu.dimension_semantics<parallel>], iteration_bounds = array<i64: 1>, scalar_prefetch = 0 : i64, scratch_operands = 0 : i64, tpu.core_type = #tpu.core_type<tc>, window_params = [{transform_indices = @transform_0, window_bounds = array<i64: 56, 512>}, {pipeline_mode = #tpu.pipeline_mode<synchronous>, transform_indices = @transform_1, window_bounds = array<i64: 32, 56>}, {pipeline_mode = #tpu.pipeline_mode<synchronous>, transform_indices = @transform_2, window_bounds = array<i64: 32, 32>}, {pipeline_mode = #tpu.pipeline_mode<synchronous>, transform_indices = @transform_3, window_bounds = array<i64: 32, 1>}, {pipeline_mode = #tpu.pipeline_mode<synchronous>, transform_indices = @transform_4, window_bounds = array<i64: 8, 32>}, {pipeline_mode = #tpu.pipeline_mode<synchronous>, transform_indices = @transform_5, window_bounds = array<i64: 8, 1>}, {transform_indices = @transform_6, window_bounds = array<i64: 8, 512>}]} {
    %c0 = arith.constant 0 : index
    %c0_0 = arith.constant 0 : index
    %0 = vector.load %arg2[%c0, %c0_0] : memref<32x56xf32, #tpu.memory_space<vmem>>, vector<32x56xf32>
    %c0_1 = arith.constant 0 : index
    %c0_2 = arith.constant 0 : index
    %1 = vector.load %arg1[%c0_1, %c0_2] : memref<56x512xf32, #tpu.memory_space<vmem>>, vector<56x512xf32>
    %cst = arith.constant dense<0.000000e+00> : vector<32x512xf32>
    %2 = tpu.matmul %0, %1, %cst {dimension_numbers = #tpu.dot_dimension_numbers<[1], [0], [0], [1], [0, 0, 1, 1], [], []>} : vector<32x56xf32>, vector<56x512xf32>, vector<32x512xf32> -> vector<32x512xf32>
    %cst_3 = arith.constant 0.000000e+00 : f32
    %3 = vector.broadcast %cst_3 : f32 to vector<32x512xf32>
    %4 = arith.maximumf %2, %3 : vector<32x512xf32>
    %c0_4 = arith.constant 0 : index
    %c0_5 = arith.constant 0 : index
    %5 = vector.load %arg3[%c0_4, %c0_5] : memref<32x32xf32, #tpu.memory_space<vmem>>, vector<32x32xf32>
    %cst_6 = arith.constant dense<0.000000e+00> : vector<32x512xf32>
    %6 = tpu.matmul %5, %4, %cst_6 {dimension_numbers = #tpu.dot_dimension_numbers<[1], [0], [0], [1], [0, 0, 1, 1], [], []>} : vector<32x32xf32>, vector<32x512xf32>, vector<32x512xf32> -> vector<32x512xf32>
    %c0_7 = arith.constant 0 : index
    %c0_8 = arith.constant 0 : index
    %7 = vector.load %arg4[%c0_7, %c0_8] : memref<32x1xf32, #tpu.memory_space<vmem>>, vector<32x1xf32>
    %8 = vector.broadcast %7 : vector<32x1xf32> to vector<32x512xf32>
    %9 = arith.addf %6, %8 : vector<32x512xf32>
    %cst_9 = arith.constant 0.000000e+00 : f32
    %10 = vector.broadcast %cst_9 : f32 to vector<32x512xf32>
    %11 = arith.maximumf %9, %10 : vector<32x512xf32>
    %c0_10 = arith.constant 0 : index
    %c0_11 = arith.constant 0 : index
    %12 = vector.load %arg5[%c0_10, %c0_11] : memref<8x32xf32, #tpu.memory_space<vmem>>, vector<8x32xf32>
    %cst_12 = arith.constant dense<0.000000e+00> : vector<8x512xf32>
    %13 = tpu.matmul %12, %11, %cst_12 {dimension_numbers = #tpu.dot_dimension_numbers<[1], [0], [0], [1], [0, 0, 1, 1], [], []>} : vector<8x32xf32>, vector<32x512xf32>, vector<8x512xf32> -> vector<8x512xf32>
    %c0_13 = arith.constant 0 : index
    %c0_14 = arith.constant 0 : index
    %14 = vector.load %arg6[%c0_13, %c0_14] : memref<8x1xf32, #tpu.memory_space<vmem>>, vector<8x1xf32>
    %15 = vector.broadcast %14 : vector<8x1xf32> to vector<8x512xf32>
    %16 = arith.addf %13, %15 : vector<8x512xf32>
    %cst_15 = arith.constant 0.000000e+00 : f32
    %17 = vector.broadcast %cst_15 : f32 to vector<8x512xf32>
    %18 = arith.maximumf %16, %17 : vector<8x512xf32>
    %c0_16 = arith.constant 0 : index
    %c0_17 = arith.constant 0 : index
    %19 = vector.load %arg7[%c0_16, %c0_17] : memref<8x512xf32, #tpu.memory_space<vmem>>, vector<8x512xf32>
    tpu.vector_store %arg7[%c0_16, %c0_17], %18 {strides = array<i32>} : memref<8x512xf32, #tpu.memory_space<vmem>>, vector<8x512xf32>,
    return
  }
  func.func @transform_0(%arg0: i32) -> (i32, i32) {
    %c0_i32 = arith.constant 0 : i32
    %c0_i32_0 = arith.constant 0 : i32
    return %c0_i32, %arg0 : i32, i32
  }
  func.func @transform_1(%arg0: i32) -> (i32, i32) {
    %c0_i32 = arith.constant 0 : i32
    %c0_i32_0 = arith.constant 0 : i32
    %c0_i32_1 = arith.constant 0 : i32
    return %c0_i32, %c0_i32_0 : i32, i32
  }
  func.func @transform_2(%arg0: i32) -> (i32, i32) {
    %c0_i32 = arith.constant 0 : i32
    %c0_i32_0 = arith.constant 0 : i32
    %c0_i32_1 = arith.constant 0 : i32
    return %c0_i32, %c0_i32_0 : i32, i32
  }
  func.func @transform_3(%arg0: i32) -> (i32, i32) {
    %c0_i32 = arith.constant 0 : i32
    %c0_i32_0 = arith.constant 0 : i32
    %c0_i32_1 = arith.constant 0 : i32
    return %c0_i32, %c0_i32_0 : i32, i32
  }
  func.func @transform_4(%arg0: i32) -> (i32, i32) {
    %c0_i32 = arith.constant 0 : i32
    %c0_i32_0 = arith.constant 0 : i32
    %c0_i32_1 = arith.constant 0 : i32
    return %c0_i32, %c0_i32_0 : i32, i32
  }
  func.func @transform_5(%arg0: i32) -> (i32, i32) {
    %c0_i32 = arith.constant 0 : i32
    %c0_i32_0 = arith.constant 0 : i32
    %c0_i32_1 = arith.constant 0 : i32
    return %c0_i32, %c0_i32_0 : i32, i32
  }
  func.func @transform_6(%arg0: i32) -> (i32, i32) {
    %c0_i32 = arith.constant 0 : i32
    %c0_i32_0 = arith.constant 0 : i32
    return %c0_i32, %arg0 : i32, i32
  }
}

</mosaic_0001>

<bundles_post_ra>
// kernel: nca_forward.1
= control target key start
LH: loop header
LB: loop body
LE: loop exit
PB: predicated region body
PF: predicated region fallthrough
CT: control target
= control target key end

     0   :  { %v739_v3 = vmov 0.0   ;;  %vm55_vm0 = vcmask 457728   ;;  %v740_v45 = vmov 0   ;;  %vm290_vm1 = vcmask 261120   ;;  %s950_s0 = inlined_call_operand.vmem [shape: f32[56,512], index: 0, kind: input, shape index: {}]   ;;  %s951_s1 = inlined_call_operand.vmem [shape: f32[32,56], index: 1, kind: input, shape index: {}]   ;;  %s952_s3 = inlined_call_operand.vmem [shape: f32[32,1], index: 3, kind: input, shape index: {}]   ;;  %s953_s5 = inlined_call_operand.vmem [shape: f32[8,1], index: 5, kind: input, shape index: {}]   ;;  %s954_s2 = inlined_call_operand.vmem [shape: f32[32,32], index: 2, kind: input, shape index: {}]   ;;  %s955_s4 = inlined_call_operand.vmem [shape: f32[8,32], index: 4, kind: input, shape index: {}]   ;;  %s956_s6 = inlined_call_operand.vmem [shape: f32[8,512], index: 6, kind: output, shape index: {}]  }
   0x1   :  { %v28_v0 = vld [vmem:[%s950_s0 + $0x8] sm:$0xff]  ;;  %v30_v2 = vld [vmem:[%s950_s0 + $0x18] sm:$0xff]  ;;  %132 = vmatprep.mubr.f32.mxu0 %v739_v3  ;;  %221 = vmatprep.mubr.f32.mxu1 %v739_v3  ;;  %v27_v6 = vld [vmem:[%s950_s0] sm:$0xff] }
   0x2   :  { %v32_v1 = vld [vmem:[%s950_s0 + $0x28] sm:$0xff]  ;;  %v34_v5 = vld [vmem:[%s950_s0 + $0x38] sm:$0xff]  ;;  %v31_v7 = vld [vmem:[%s950_s0 + $0x20] sm:$0xff]  ;;  %737 = vset.pattern.permute.xlu0 %v740_v45  ;;  %738 = vset.pattern.permute.xlu1 %v740_v45 }
   0x3   :  { %v679_v4 = vpack.c.bf16 %v32_v1, %v28_v0  ;;  %v691_v8 = vpack.c.bf16 %v34_v5, %v30_v2  ;;  %v681_v9 = vpack.c.bf16 %v31_v7, %v27_v6  ;;  %v29_v10 = vld [vmem:[%s950_s0 + $0x10] sm:$0xff]  ;;  %v36_v12 = vld [vmem:[%s950_s0 + $0x48] sm:$0xff]  ;;  %v38_v15 = vld [vmem:[%s950_s0 + $0x58] sm:$0xff] }
   0x4   :  { %v33_v11 = vld [vmem:[%s950_s0 + $0x30] sm:$0xff]  ;;  %v40_v14 = vld [vmem:[%s950_s0 + $0x68] sm:$0xff]  ;;  %v42_v16 = vld [vmem:[%s950_s0 + $0x78] sm:$0xff] }
   0x5   :  { %680 = vmatprep.subr.bf16.mxu0 %v679_v4  ;;  %v693_v13 = vpack.c.bf16 %v33_v11, %v29_v10  ;;  %692 = vmatprep.subr.bf16.mxu1 %v691_v8  ;;  %v683_v17 = vpack.c.bf16 %v40_v14, %v36_v12  ;;  %v695_v18 = vpack.c.bf16 %v42_v16, %v38_v15  ;;  %v35_v19 = vld [vmem:[%s950_s0 + $0x40] sm:$0xff]  ;;  %v37_v21 = vld [vmem:[%s950_s0 + $0x50] sm:$0xff]  ;;  %v44_v24 = vld [vmem:[%s950_s0 + $0x88] sm:$0xff] }
   0x6   :  { %682 = vmatpush1.bf16.msra.mxu0 %v681_v9  ;;  %v39_v20 = vld [vmem:[%s950_s0 + $0x60] sm:$0xff]  ;;  %v41_v23 = vld [vmem:[%s950_s0 + $0x70] sm:$0xff]  ;;  %v48_v25 = vld [vmem:[%s950_s0 + $0xa8] sm:$0xff] }
   0x7   :  { %694 = vmatpush1.bf16.msra.mxu1 %v693_v13  ;;  %v685_v22 = vpack.c.bf16 %v39_v20, %v35_v19  ;;  %684 = vmatprep.subr.bf16.mxu0 %v683_v17  ;;  %v697_v26 = vpack.c.bf16 %v41_v23, %v37_v21  ;;  %v687_v27 = vpack.c.bf16 %v48_v25, %v44_v24  ;;  %v46_v28 = vld [vmem:[%s950_s0 + $0x98] sm:$0xff]  ;;  %v43_v30 = vld [vmem:[%s950_s0 + $0x80] sm:$0xff]  ;;  %v45_v33 = vld [vmem:[%s950_s0 + $0x90] sm:$0xff] }
   0x8   :  { %696 = vmatprep.subr.bf16.mxu1 %v695_v18  ;;  %v50_v29 = vld [vmem:[%s950_s0 + $0xb8] sm:$0xff]  ;;  %v47_v32 = vld [vmem:[%s950_s0 + $0xa0] sm:$0xff]  ;;  %v49_v34 = vld [vmem:[%s950_s0 + $0xb0] sm:$0xff] }
   0x9   :  { %v699_v31 = vpack.c.bf16 %v50_v29, %v46_v28  ;;  %v689_v35 = vpack.c.bf16 %v47_v32, %v43_v30  ;;  %v701_v36 = vpack.c.bf16 %v49_v34, %v45_v33  ;;  %v52_v37 = vld [vmem:[%s950_s0 + $0xc8] sm:$0xff]  ;;  %v54_v38 = vld [vmem:[%s950_s0 + $0xd8] sm:$0xff]  ;;  %v51_v39 = vld [vmem:[%s950_s0 + $0xc0] sm:$0xff] }
   0xa   :  { %686 = vmatpush1.bf16.msra.mxu0 %v685_v22  ;;  %v53_v40 = vld [vmem:[%s950_s0 + $0xd0] sm:$0xff]  ;;  %v23_v41 = vld [vmem:[%s951_s1] sm:$0xff]  ;;  %v24_v42 = vld [vmem:[%s951_s1 + $0x8] sm:$0xff] }
   0xb   :  { %698 = vmatpush1.bf16.msra.mxu1 %v697_v26  ;;  %688 = vmatprep.subr.bf16.mxu0 %v687_v27  ;;  %v25_v43 = vld [vmem:[%s951_s1 + $0x10] sm:$0xff]  ;;  %v26_v44 = vld [vmem:[%s951_s1 + $0x18] sm:$0xff]  ;;  %v266_v46 = vld [vmem:[%s952_s3] sm:$0xff] }
   0xc   :  { %700 = vmatprep.subr.bf16.mxu1 %v699_v31  ;;  %272 = vperm.xlu0 %737, %v266_v46   ;;  %v268_v47 = vld [vmem:[%s952_s3 + $0x10] sm:$0xff]  ;;  %v267_v48 = vld [vmem:[%s952_s3 + $0x8] sm:$0xff]  ;;  %v269_v49 = vld [vmem:[%s952_s3 + $0x18] sm:$0xff] }
   0xd   :  { %282 = vperm.xlu1 %738, %v268_v47   ;;  %v498_v50 = vld [vmem:[%s953_s5] sm:$0xff]  ;;  %v263_v29 = vld [vmem:[%s954_s2 + $0x8] sm:$0xff]  ;;  %v264_v30 = vld [vmem:[%s954_s2 + $0x10] sm:$0xff] }
   0xe   :  { %690 = vmatpush1.bf16.msra.mxu0 %v689_v35  ;;  %v262_v28 = vld [vmem:[%s954_s2] sm:$0xff]  ;;  %v265_v31 = vld [vmem:[%s954_s2 + $0x18] sm:$0xff] }
   0xf   :  { %702 = vmatpush1.bf16.msra.mxu1 %v701_v36  ;;  %80 = vmatprep.subr.mxu0 %v52_v37 }
  0x10   :  { %169 = vmatprep.subr.mxu1 %v54_v38  ;;  %277 = vperm.xlu0 %737, %v267_v48  }
  0x11   :  { %287 = vperm.xlu1 %738, %v269_v49  }
  0x12   :  { %81 = vmatpush1.msra.mxu0 %v51_v39 }
  0x13   :  { %170 = vmatpush1.msra.mxu1 %v53_v40  ;;  %661 = vmatmul.mubr.msk.f32.vlgmr.msra.gmra.mrb[0].mxu0 %vm55_vm0, %v23_v41 }
  0x14   :  { %665 = vmatmul.mubr.msk.f32.vlgmr.msra.gmra.mrb[0].mxu1 %vm55_vm0, %v23_v41  ;;  %138 = vmatprep.mubr.f32.mxu0 %v739_v3 }
  0x15   :  { %227 = vmatprep.mubr.f32.mxu1 %v739_v3  ;;  %501 = vperm.xlu0 %737, %v498_v50  }
  0x17   :  { %662 = vmatmul.mubr.msk.f32.gmra.mrb[2].mxu0 %vm55_vm0, %v24_v42 }
  0x18   :  { %666 = vmatmul.mubr.msk.f32.gmra.mrb[2].mxu1 %vm55_vm0, %v24_v42  ;;  %144 = vmatprep.mubr.f32.mxu0 %v739_v3 }
  0x19   :  { %233 = vmatprep.mubr.f32.mxu1 %v739_v3 }
  0x1b   :  { %663 = vmatmul.mubr.msk.f32.gmra.mrb[4].mxu0 %vm55_vm0, %v25_v43 }
  0x1c   :  { %667 = vmatmul.mubr.msk.f32.gmra.mrb[4].mxu1 %vm55_vm0, %v25_v43  ;;  %150 = vmatprep.mubr.f32.mxu0 %v739_v3 }
  0x1d   :  { %239 = vmatprep.mubr.f32.mxu1 %v739_v3 }
  0x1f   :  { %664 = vmatmul.mubr.msk.f32.gmra.mrb[6].mxu0 %vm55_vm0, %v26_v44 }
  0x20   :  { %668 = vmatmul.mubr.msk.f32.gmra.mrb[6].mxu1 %vm55_vm0, %v26_v44  ;;  %367 = vmatprep.mubr.f32.mxu0 %v739_v3 }
  0x21   :  { %456 = vmatprep.mubr.f32.mxu1 %v739_v3 }
  0x8b   :  { %v273_v32 = vpop.permute.xlu0 %272 }
  0x8c   :  { %v283_v47 = vpop.permute.xlu1 %282 }
  0x8f   :  { %v278_v38 = vpop.permute.xlu0 %277 }
  0xe6   :  { %v134_v51 = vpop.f32.mrb[0].mxu0 }
  0xe7   :  { %v223_v52 = vpop.f32.mrb[0].mxu1  ;;  %v136_v53 = vpop.f32.mrb[1].mxu0  ;;  %v246_v56 = vmax.f32 %v134_v51, 0.0 }
  0xe8   :  { %v225_v54 = vpop.f32.mrb[1].mxu1  ;;  %v248_v60 = vmax.f32 %v223_v52, 0.0  ;;  %v247_v61 = vmax.f32 %v136_v53, 0.0 }
  0xe9   :  { %v249_v1 = vmax.f32 %v225_v54, 0.0 }
  0xea   :  { %v140_v55 = vpop.f32.mrb[2].mxu0 }
  0xeb   :  { %v250_v57 = vmax.f32 %v140_v55, 0.0  ;;  %v229_v58 = vpop.f32.mrb[2].mxu1  ;;  %v142_v59 = vpop.f32.mrb[3].mxu0 }
  0xec   :  { %v252_v62 = vmax.f32 %v229_v58, 0.0  ;;  %v251_v63 = vmax.f32 %v142_v59, 0.0  ;;  %v231_v0 = vpop.f32.mrb[3].mxu1 }
  0xed   :  { %v705_v2 = vpack.c.bf16 %v250_v57, %v246_v56  ;;  %v253_v4 = vmax.f32 %v231_v0, 0.0 }
  0xee   :  { %v713_v5 = vpack.c.bf16 %v252_v62, %v248_v60  ;;  %v703_v6 = vpack.c.bf16 %v251_v63, %v247_v61  ;;  %v146_v7 = vpop.f32.mrb[4].mxu0 }
  0xef   :  { %v711_v8 = vpack.c.bf16 %v253_v4, %v249_v1  ;;  %v235_v9 = vpop.f32.mrb[4].mxu1  ;;  %v148_v10 = vpop.f32.mrb[5].mxu0  ;;  %v254_v13 = vmax.f32 %v146_v7, 0.0 }
  0xf0   :  { %v237_v11 = vpop.f32.mrb[5].mxu1  ;;  %704 = vmatprep.subr.bf16.mxu0 %v703_v6  ;;  %v256_v17 = vmax.f32 %v235_v9, 0.0  ;;  %v255_v18 = vmax.f32 %v148_v10, 0.0 }
  0xf1   :  { %712 = vmatprep.subr.bf16.mxu1 %v711_v8  ;;  %706 = vmatpush1.bf16.msra.mxu0 %v705_v2  ;;  %v257_v22 = vmax.f32 %v237_v11, 0.0 }
  0xf2   :  { %714 = vmatpush1.bf16.msra.mxu1 %v713_v5  ;;  %v152_v12 = vpop.f32.mrb[6].mxu0  ;;  %v288_v5 = vpop.permute.xlu1 %287 }
  0xf3   :  { %v258_v14 = vmax.f32 %v152_v12, 0.0  ;;  %v241_v15 = vpop.f32.mrb[6].mxu1  ;;  %v154_v16 = vpop.f32.mrb[7].mxu0 }
  0xf4   :  { %v260_v19 = vmax.f32 %v241_v15, 0.0  ;;  %v259_v20 = vmax.f32 %v154_v16, 0.0  ;;  %v243_v21 = vpop.f32.mrb[7].mxu1 }
  0xf5   :  { %v709_v23 = vpack.c.bf16 %v258_v14, %v254_v13  ;;  %v261_v24 = vmax.f32 %v243_v21, 0.0 }
  0xf6   :  { %v717_v25 = vpack.c.bf16 %v260_v19, %v256_v17  ;;  %v707_v26 = vpack.c.bf16 %v259_v20, %v255_v18 }
  0xf7   :  { %v715_v27 = vpack.c.bf16 %v261_v24, %v257_v22 }
  0xf8   :  { %708 = vmatprep.subr.bf16.mxu0 %v707_v26 }
  0xf9   :  { %716 = vmatprep.subr.bf16.mxu1 %v715_v27  ;;  %710 = vmatpush1.bf16.msra.mxu0 %v709_v23 }
  0xfa   :  { %718 = vmatpush1.bf16.msra.mxu1 %v717_v25 }
  0xfc   :  { %669 = vmatmul.mubr.msk.f32.vlgmr.msra.gmra.mrb[8].mxu0 %vm290_vm1, %v262_v28 }
  0xfd   :  { %673 = vmatmul.mubr.msk.f32.vlgmr.msra.gmra.mrb[8].mxu1 %vm290_vm1, %v262_v28  ;;  %373 = vmatprep.mubr.f32.mxu0 %v739_v3  ;;  %v497_v28 = vld [vmem:[%s955_s4] sm:$0xff] }
  0xfe   :  { %462 = vmatprep.mubr.f32.mxu1 %v739_v3 }
 0x100   :  { %670 = vmatmul.mubr.msk.f32.gmra.mrb[10].mxu0 %vm290_vm1, %v263_v29 }
 0x101   :  { %674 = vmatmul.mubr.msk.f32.gmra.mrb[10].mxu1 %vm290_vm1, %v263_v29  ;;  %379 = vmatprep.mubr.f32.mxu0 %v739_v3  ;;  %v502_v29 = vpop.permute.xlu0 %501 }
 0x102   :  { %468 = vmatprep.mubr.f32.mxu1 %v739_v3 }
 0x104   :  { %671 = vmatmul.mubr.msk.f32.gmra.mrb[12].mxu0 %vm290_vm1, %v264_v30 }
 0x105   :  { %675 = vmatmul.mubr.msk.f32.gmra.mrb[12].mxu1 %vm290_vm1, %v264_v30  ;;  %385 = vmatprep.mubr.f32.mxu0 %v739_v3 }
 0x106   :  { %474 = vmatprep.mubr.f32.mxu1 %v739_v3 }
 0x108   :  { %672 = vmatmul.mubr.msk.f32.gmra.mrb[14].mxu0 %vm290_vm1, %v265_v31 }
 0x109   :  { %676 = vmatmul.mubr.msk.f32.gmra.mrb[14].mxu1 %vm290_vm1, %v265_v31  ;;  %571 = vmatprep.mubr.f32.mxu0 %v739_v3 }
 0x10a   :  { %642 = vmatprep.mubr.f32.mxu1 %v739_v3 }
 0x1cf   :  { %v369_v33 = vpop.f32.mrb[8].mxu0 }
 0x1d0   :  { %v458_v34 = vpop.f32.mrb[8].mxu1  ;;  %v371_v35 = vpop.f32.mrb[9].mxu0  ;;  %v370_v37 = vadd.f32 %v369_v33, %v273_v32 }
 0x1d1   :  { %v460_v36 = vpop.f32.mrb[9].mxu1  ;;  %v459_v39 = vadd.f32 %v458_v34, %v273_v32  ;;  %v372_v40 = vadd.f32 %v371_v35, %v273_v32 }
 0x1d2   :  { %v461_v42 = vadd.f32 %v460_v36, %v273_v32  ;;  %v481_v50 = vmax.f32 %v370_v37, 0.0 }
 0x1d3   :  { %v375_v41 = vpop.f32.mrb[10].mxu0  ;;  %v483_v52 = vmax.f32 %v459_v39, 0.0  ;;  %v482_v53 = vmax.f32 %v372_v40, 0.0 }
 0x1d4   :  { %v376_v43 = vadd.f32 %v375_v41, %v278_v38  ;;  %v464_v44 = vpop.f32.mrb[10].mxu1  ;;  %v377_v45 = vpop.f32.mrb[11].mxu0  ;;  %v484_v57 = vmax.f32 %v461_v42, 0.0 }
 0x1d5   :  { %v465_v46 = vadd.f32 %v464_v44, %v278_v38  ;;  %v378_v48 = vadd.f32 %v377_v45, %v278_v38  ;;  %v466_v49 = vpop.f32.mrb[11].mxu1 }
 0x1d6   :  { %v485_v3 = vmax.f32 %v376_v43, 0.0  ;;  %v467_v51 = vadd.f32 %v466_v49, %v278_v38 }
 0x1d7   :  { %v487_v54 = vmax.f32 %v465_v46, 0.0  ;;  %v486_v55 = vmax.f32 %v378_v48, 0.0  ;;  %v381_v56 = vpop.f32.mrb[12].mxu0 }
 0x1d8   :  { %v721_v58 = vpack.c.bf16 %v485_v3, %v481_v50  ;;  %v488_v59 = vmax.f32 %v467_v51, 0.0  ;;  %v470_v60 = vpop.f32.mrb[12].mxu1  ;;  %v383_v61 = vpop.f32.mrb[13].mxu0  ;;  %v382_v2 = vadd.f32 %v381_v56, %v283_v47 }
 0x1d9   :  { %v729_v62 = vpack.c.bf16 %v487_v54, %v483_v52  ;;  %v719_v63 = vpack.c.bf16 %v486_v55, %v482_v53  ;;  %v472_v0 = vpop.f32.mrb[13].mxu1  ;;  %v471_v4 = vadd.f32 %v470_v60, %v283_v47  ;;  %v384_v6 = vadd.f32 %v383_v61, %v283_v47 }
 0x1da   :  { %v727_v1 = vpack.c.bf16 %v488_v59, %v484_v57  ;;  %v473_v8 = vadd.f32 %v472_v0, %v283_v47  ;;  %v489_v15 = vmax.f32 %v382_v2, 0.0 }
 0x1db   :  { %v387_v7 = vpop.f32.mrb[14].mxu0  ;;  %720 = vmatprep.subr.bf16.mxu0 %v719_v63  ;;  %v491_v18 = vmax.f32 %v471_v4, 0.0  ;;  %v490_v19 = vmax.f32 %v384_v6, 0.0 }
 0x1dc   :  { %v388_v9 = vadd.f32 %v387_v7, %v288_v5  ;;  %v476_v10 = vpop.f32.mrb[14].mxu1  ;;  %728 = vmatprep.subr.bf16.mxu1 %v727_v1  ;;  %v389_v11 = vpop.f32.mrb[15].mxu0  ;;  %722 = vmatpush1.bf16.msra.mxu0 %v721_v58  ;;  %v492_v22 = vmax.f32 %v473_v8, 0.0 }
 0x1dd   :  { %v477_v12 = vadd.f32 %v476_v10, %v288_v5  ;;  %v390_v13 = vadd.f32 %v389_v11, %v288_v5  ;;  %v478_v14 = vpop.f32.mrb[15].mxu1  ;;  %730 = vmatpush1.bf16.msra.mxu1 %v729_v62 }
 0x1de   :  { %v493_v16 = vmax.f32 %v388_v9, 0.0  ;;  %v479_v17 = vadd.f32 %v478_v14, %v288_v5 }
 0x1df   :  { %v495_v20 = vmax.f32 %v477_v12, 0.0  ;;  %v494_v21 = vmax.f32 %v390_v13, 0.0 }
 0x1e0   :  { %v725_v23 = vpack.c.bf16 %v493_v16, %v489_v15  ;;  %v496_v24 = vmax.f32 %v479_v17, 0.0 }
 0x1e1   :  { %v733_v25 = vpack.c.bf16 %v495_v20, %v491_v18  ;;  %v723_v26 = vpack.c.bf16 %v494_v21, %v490_v19 }
 0x1e2   :  { %v731_v27 = vpack.c.bf16 %v496_v24, %v492_v22 }
 0x1e3   :  { %724 = vmatprep.subr.bf16.mxu0 %v723_v26 }
 0x1e4   :  { %732 = vmatprep.subr.bf16.mxu1 %v731_v27  ;;  %726 = vmatpush1.bf16.msra.mxu0 %v725_v23 }
 0x1e5   :  { %734 = vmatpush1.bf16.msra.mxu1 %v733_v25 }
 0x1e7   :  { %677 = vmatmul.mubr.msk.f32.vlgmr.msra.gmra.mrb[16].mxu0 %vm290_vm1, %v497_v28 }
 0x1e8   :  { %678 = vmatmul.mubr.msk.f32.vlgmr.msra.gmra.mrb[16].mxu1 %vm290_vm1, %v497_v28 }
 0x2ba   :  { %v573_v30 = vpop.f32.mrb[16].mxu0 }
 0x2bb   :  { %v574_v31 = vadd.f32 %v573_v30, %v502_v29  ;;  %v644_v32 = vpop.f32.mrb[16].mxu1  ;;  %v575_v33 = vpop.f32.mrb[17].mxu0 }
 0x2bc   :  { %v645_v34 = vadd.f32 %v644_v32, %v502_v29  ;;  %v576_v35 = vadd.f32 %v575_v33, %v502_v29  ;;  %v646_v36 = vpop.f32.mrb[17].mxu1 }
 0x2bd   :  { %v649_v37 = vmax.f32 %v574_v31, 0.0  ;;  %v647_v38 = vadd.f32 %v646_v36, %v502_v29 }
 0x2be   :  { %v651_v39 = vmax.f32 %v645_v34, 0.0  ;;  %v650_v40 = vmax.f32 %v576_v35, 0.0 }
 0x2bf   :  { %653 = vst [vmem:[%s956_s6] sm:$0xff] %v649_v37  ;;  %v652_v41 = vmax.f32 %v647_v38, 0.0 }
 0x2c0   :  { %655 = vst [vmem:[%s956_s6 + $0x10] sm:$0xff] %v651_v39  ;;  %654 = vst [vmem:[%s956_s6 + $0x8] sm:$0xff] %v650_v40 }
 0x2c1   :  { %656 = vst [vmem:[%s956_s6 + $0x18] sm:$0xff] %v652_v41 }

</bundles_post_ra>
